<compile_context>
chip_gen: v7x
topology: tpu7x:2x2x1
jax: 0.10.0
libtpu: 0.0.40
codegen_flags: <defaults>
</compile_context>

<pallas_src>
import jax
import jax.numpy as jnp
import numpy as np
from jax.experimental import pallas as pl
from jax.experimental.pallas import tpu as pltpu


def _baseline_step_kernel(h_ref, w_ref, b_ref, o_ref):
    """relu(h @ W^T + b) for a single output unit, single step, VPU/XLU only.

    h_ref: (B, D)  VMEM  activations (f32 or bf16; accumulated in f32)
    w_ref: (1, D)  VMEM  nn.Linear weight row (PyTorch (O, D) layout, O == 1)
    b_ref: (1,)    SMEM  scalar bias
    o_ref: (B, 1)  VMEM  baseline output
    """
    h = h_ref[...].astype(jnp.float32)                      # (B, D)  VPU cast (no-op for f32)
    w = w_ref[...].astype(jnp.float32)                      # (1, D)
    acc = jnp.sum(h * w, axis=-1, keepdims=True)            # VPU mul + XLU lane reduce -> (B, 1)
    acc = acc + b_ref[0]                                    # scalar bias from SMEM
    o_ref[...] = jnp.maximum(acc, 0.0).astype(o_ref.dtype)  # ReLU, f32 epilogue


def _baseline_seq_kernel(h_ref, w_ref, b_ref, o_ref):
    """Fused over timesteps: one grid step == one RNN timestep.

    h_ref: (1, B, D)  VMEM  activations for timestep t
    w_ref: (1, D)     VMEM  weight row (constant block index -> stays resident)
    b_ref: (1,)       SMEM  scalar bias (untiled, resident)
    o_ref: (1, B, 1)  VMEM  baseline for timestep t
    """
    h = h_ref[0].astype(jnp.float32)                        # (B, D)
    w = w_ref[...].astype(jnp.float32)                      # (1, D)
    acc = jnp.sum(h * w, axis=-1, keepdims=True) + b_ref[0] # (B, 1)
    o_ref[0] = jnp.maximum(acc, 0.0).astype(o_ref.dtype)


def baseline_network_forward(h_t, weight, bias):
    """Pallas equivalent of F.relu(nn.Linear(D, 1)(h_t.detach())) — one step.

    Args:
      h_t:    (B, D) float32 (or bfloat16)
      weight: (O, D) float32   (PyTorch nn.Linear convention, O == 1)
      bias:   (O,)   float32
    Returns:
      b_t:    (B, O) float32
    """
    B, D = h_t.shape
    O = weight.shape[0]
    assert O == 1, "baseline_network has a single output unit"

    cost = pl.CostEstimate(
        flops=2 * B * D + 2 * B,
        bytes_accessed=4 * (B * D + D + 1 + B),
        transcendentals=0,
    )
    return pl.pallas_call(
        _baseline_step_kernel,
        out_shape=jax.ShapeDtypeStruct((B, O), jnp.float32),
        in_specs=[
            pl.BlockSpec(memory_space=pltpu.MemorySpace.VMEM),   # h_t
            pl.BlockSpec(memory_space=pltpu.MemorySpace.VMEM),   # weight (O, D)
            pl.BlockSpec(memory_space=pltpu.MemorySpace.SMEM),   # bias (O,)
        ],
        out_specs=pl.BlockSpec(memory_space=pltpu.MemorySpace.VMEM),
        cost_estimate=cost,
    )(h_t, weight, bias)


def baseline_network_forward_fused(h_seq, weight, bias):
    """Fused baseline over a whole sequence of hidden states in ONE pallas_call.

    Equivalent to stacking baseline_network_forward over the leading T axis,
    but the weight/bias stay VMEM/SMEM-resident across all timesteps and only
    one kernel dispatch is paid.

    Args:
      h_seq:  (T, B, D) float32 (or bfloat16 on v6e/v7x to halve HBM traffic)
      weight: (O, D)    float32, O == 1
      bias:   (O,)      float32
    Returns:
      b_seq:  (T, B, O) float32
    """
    T, B, D = h_seq.shape
    O = weight.shape[0]
    assert O == 1, "baseline_network has a single output unit"

    bytes_per_el = jnp.dtype(h_seq.dtype).itemsize
    cost = pl.CostEstimate(
        flops=2 * T * B * D + 2 * T * B,
        bytes_accessed=bytes_per_el * T * B * D + 4 * (D + 1 + T * B),
        transcendentals=0,
    )
    return pl.pallas_call(
        _baseline_seq_kernel,
        out_shape=jax.ShapeDtypeStruct((T, B, O), jnp.float32),
        grid=(T,),
        in_specs=[
            pl.BlockSpec((1, B, D), lambda t: (t, 0, 0)),        # per-step activations
            pl.BlockSpec((1, D), lambda t: (0, 0)),              # weight: constant block -> resident
            pl.BlockSpec(memory_space=pltpu.MemorySpace.SMEM),   # bias: untiled SMEM scalar
        ],
        out_specs=pl.BlockSpec((1, B, O), lambda t: (t, 0, 0)),
        compiler_params=pltpu.CompilerParams(
            dimension_semantics=("parallel",),                   # v7x: split T across the 2 TCs
        ),
        cost_estimate=cost,
    )(h_seq, weight, bias)


if __name__ == "__main__":
    # baseline_network(input_size=32, output_size=1), batch B=8, sequence T=16
    B, D, O = 8, 32, 1
    T = 16

    key = jax.random.PRNGKey(0)
    k_h, k_w, k_b, k_seq = jax.random.split(key, 4)

    # Deterministic parameter init mimicking nn.Linear default (+/- 1/sqrt(fan_in))
    bound = 1.0 / np.sqrt(D)
    weight = jax.random.uniform(k_w, (O, D), minval=-bound, maxval=bound,
                                dtype=jnp.float32)
    bias = jax.random.uniform(k_b, (O,), minval=-bound, maxval=bound,
                              dtype=jnp.float32)

    # --- single step: exact semantics of the PyTorch module's forward ---
    # (.detach() is an autograd-only no-op in the forward pass)
    h_t = jax.random.normal(k_h, (B, D), dtype=jnp.float32)
    b_t = jax.block_until_ready(baseline_network_forward(h_t, weight, bias))
    ref = jnp.maximum(h_t @ weight.T + bias, 0.0)
    np.testing.assert_allclose(np.asarray(b_t), np.asarray(ref),
                               rtol=1e-5, atol=1e-5)

    # --- fused sequence: the whole timestep loop in one pallas_call ---
    h_seq = jax.random.normal(k_seq, (T, B, D), dtype=jnp.float32)
    b_seq = jax.block_until_ready(
        baseline_network_forward_fused(h_seq, weight, bias))
    ref_seq = jnp.maximum(
        jnp.einsum("tbd,od->tbo", h_seq, weight) + bias, 0.0)
    np.testing.assert_allclose(np.asarray(b_seq), np.asarray(ref_seq),
                               rtol=1e-5, atol=1e-5)

    print("KERNEL_OK")
</pallas_src>

<mosaic_0001>
module attributes {stable_mosaic.version = 11 : i64} {
  func.func @_baseline_step_kernel(%arg0: memref<8x32xf32, #tpu.memory_space<vmem>>, %arg1: memref<1x32xf32, #tpu.memory_space<vmem>>, %arg2: memref<1xf32, #tpu.memory_space<smem>>, %arg3: memref<8x1xf32, #tpu.memory_space<vmem>>) attributes {dimension_semantics = [], scalar_prefetch = 0 : i64, scratch_operands = 0 : i64, tpu.core_type = #tpu.core_type<tc>} {
    %c0 = arith.constant 0 : index
    %c0_0 = arith.constant 0 : index
    %0 = vector.load %arg0[%c0, %c0_0] : memref<8x32xf32, #tpu.memory_space<vmem>>, vector<8x32xf32>
    %c0_1 = arith.constant 0 : index
    %c0_2 = arith.constant 0 : index
    %1 = vector.load %arg1[%c0_1, %c0_2] : memref<1x32xf32, #tpu.memory_space<vmem>>, vector<1x32xf32>
    %2 = vector.broadcast %1 : vector<1x32xf32> to vector<8x32xf32>
    %3 = arith.mulf %0, %2 : vector<8x32xf32>
    %cst = arith.constant dense<0.000000e+00> : vector<8xf32>
    %4 = vector.multi_reduction <add>, %3, %cst [1] : vector<8x32xf32> to vector<8xf32>
    %5 = vector.shape_cast %4 : vector<8xf32> to vector<8x1xf32>
    %c0_3 = arith.constant 0 : index
    %6 = memref.load %arg2[%c0_3] : memref<1xf32, #tpu.memory_space<smem>>
    %7 = vector.broadcast %6 : f32 to vector<8x1xf32>
    %8 = arith.addf %5, %7 : vector<8x1xf32>
    %cst_4 = arith.constant 0.000000e+00 : f32
    %9 = vector.broadcast %cst_4 : f32 to vector<8x1xf32>
    %10 = arith.maximumf %8, %9 : vector<8x1xf32>
    %c0_5 = arith.constant 0 : index
    %c0_6 = arith.constant 0 : index
    %11 = vector.load %arg3[%c0_5, %c0_6] : memref<8x1xf32, #tpu.memory_space<vmem>>, vector<8x1xf32>
    tpu.vector_store %arg3[%c0_5, %c0_6], %10 {strides = array<i32>} : memref<8x1xf32, #tpu.memory_space<vmem>>, vector<8x1xf32>,
    return
  }
}

</mosaic_0001>

<bundles_post_ra>
// kernel: tpu_custom_call.1
= control target key start
LH: loop header
LB: loop body
LE: loop exit
PB: predicated region body
PF: predicated region fallthrough
CT: control target
= control target key end

     0   :  { %9 = vsyncpa [#allocation4], 0  ;;  %s77_s12 = smov [#allocation3]   ;;  %s119_s0 = inlined_call_operand.hbm [shape: f32[8,32], index: 0, kind: input, shape index: {}]   ;;  %s120_s1 = inlined_call_operand.vmem [shape: f32[1,32], index: 1, kind: input, shape index: {}]   ;;  %s121_s2 = inlined_call_operand.<no memory space> [shape: f32[1], index: 2, kind: input, shape index: {}]   ;;  %s122_s3 = inlined_call_operand.vmem [shape: f32[8,1], index: 3, kind: output, shape index: {}]  }
   0x1   :  { %s16_s13 = sshll.u32 %s77_s12, 4  ;;  %s53_s16 = scalar_lea.hbm %s119_s0, 128  ;;  %s17_s13 = int_to_ptr.vmem [resolvable:$true] %s16_s13 }
   0x2   :  { %p54_p0 = scmp.ne.s32.totalorder %s119_s0, %s53_s16  ;;  %p57_p1 = scmp.lt.u32.totalorder %s53_s16, %s119_s0 }
   0x4   :  { %p59_p2 = pnand %p57_p1, %p54_p0 }
   0x6   :  { %62 = shalt.err (!%p59_p2)
}
   0x7   :  { %s63_s21 = scalar_lea.vmem %s17_s13, 128  ;;  %p68_p4 = scmp.lt.s32.totalorder %s17_s13, %s17_s13 }
   0x8   :  { %p64_p3 = scmp.ne.s32.totalorder %s17_s13, %s63_s21  ;;  %p69_p5 = scmp.lt.s32.totalorder %s63_s21, %s63_s21 }
   0xa   :  { %p70_p6 = por %p69_p5, %p68_p4 }
   0xc   :  { %p71_p7 = pnand %p70_p6, %p64_p3 }
   0xe   :  { %74 = shalt.err (!%p71_p7)
}
   0xf   :  { %19 = dma.hbm_to_vmem [thread:$0]  %s119_s0, 128, %s17_s13, [#allocation4]  }
  0x10   :  { %75 = dma.done.wait [#allocation4], 128  }
  0x11   :  { %76 = vsyncadd [#allocation4], 4294967168  ;;  %v27_v0 = vld [vmem:[#allocation3] sm:$0xff]  ;;  %vm36_vm0 = vcmask 261120   ;;  %v41_v4 = vstv %s121_s2  ;;  %vm44_vm1 = vcmask 7168  }
  0x12   :  { %v51_v1 = vld [vmem:[%s120_s1] ss:$0 sm:$0xff] }
  0x13   :  { %v35_v2 = vmul.f32 %v51_v1, %v27_v0 }
  0x15   :  { %v37_v3 = vsel %vm36_vm0, %v35_v2, 0.0 }
  0x16   :  { %38 = vadd.xlane.f32.xlu0 %v37_v3 }
  0xa3   :  { %v39_v5 = vpop.xlane.xlu0 %38 }
  0xa4   :  { %v42_v6 = vadd.f32 %v41_v4, %v39_v5 }
  0xa6   :  { %v43_v7 = vmax.f32 %v42_v6, 0.0 }
  0xa8   :  { %45 = vst.msk [vmem:[%s122_s3] sm:$0xff] %vm44_vm1, %v43_v7 }
  0xa9   :  { %50 = vsyncpa [#allocation4], 1 }

</bundles_post_ra>
